<compile_context>
chip_gen: v5e
topology: v5e:2x2
jax: 0.10.0
libtpu: 0.0.40
codegen_flags: <defaults>
</compile_context>

<pallas_src>
import jax
import jax.numpy as jnp
from jax.experimental import pallas as pl
from jax.experimental.pallas import tpu as pltpu


# ------------------------------ helpers ---------------------------------------

_MiB = 1024 * 1024
_VMEM_CEILING_CACHE = [None]


def _round_up(x, m):
    return ((x + m - 1) // m) * m


def _vmem_ceiling_bytes():
    """Usable VMEM budget (physical capacity minus pipeline/compiler headroom)."""
    if _VMEM_CEILING_CACHE[0] is not None:
        return _VMEM_CEILING_CACHE[0]
    cap = 64 * _MiB  # conservative default (v7x per-TC capacity)
    try:
        info = pltpu.get_tpu_info()
        cap = int(getattr(info, "vmem_capacity_bytes", cap))
    except Exception:
        pass
    ceiling = max(32 * _MiB, min(int(cap * 3 // 4), 96 * _MiB))
    _VMEM_CEILING_CACHE[0] = ceiling
    return ceiling


def _tile_vmem_bytes(tm, th, E, x_bytes, w_bytes, out_bytes):
    """Double-buffered block footprint + resident f32 accumulator scratch."""
    dbl = 2 * (tm * E * x_bytes          # x row tile
               + E * th * w_bytes        # w1 hidden panel
               + th * E * w_bytes        # w2 hidden panel
               + th * 4 + E * 4          # b1 / b2 panels (f32)
               + tm * E * out_bytes)     # output row tile
    return dbl + tm * E * 4              # f32 accumulator


def _choose_tiles(N, E, H, x_bytes, w_bytes, out_bytes, ceiling):
    """Pick (tm, th): MXU-shaped panels, VMEM-budgeted, >=2 row tiles if possible."""
    th_cands = [c for c in (512, 256, 128) if c <= H and H % c == 0] or [H]
    tm_cands = (1024, 512, 256, 128, 64, 32, 16, 8)
    for th in th_cands:                       # keep th large (full MXU panel)
        for tm in tm_cands:                   # shrink tm first when VMEM is tight
            if tm > max(N, 8):
                continue
            if N > 8 and tm >= N:
                continue                      # keep >=2 row tiles for megacore
            if _tile_vmem_bytes(tm, th, E, x_bytes, w_bytes, out_bytes) <= ceiling:
                return tm, th
    return 8, th_cands[-1]                    # last-resort smallest tiles


# ------------------------------ Pallas kernel ---------------------------------

def ffn_kernel(x_ref, w1_ref, b1_ref, w2_ref, b2_ref, o_ref, acc_ref):
    """One (row-tile, hidden-tile) grid step of relu(x@w1+b1) @ w2 + b2."""
    h_idx = pl.program_id(1)

    @pl.when(h_idx == 0)
    def _init():
        # Fold b2 into the accumulator init: the (tm, E) broadcast happens once
        # per row tile, not once per hidden tile.
        acc_ref[...] = jnp.broadcast_to(
            b2_ref[...].astype(jnp.float32), acc_ref.shape)

    # Cast the x tile to the MXU compute dtype on load (no wrapper-side pass).
    xv = x_ref[...].astype(w1_ref.dtype)
    # First matmul on the MXU: bf16 operands, f32 accumulation.
    h = jnp.dot(xv, w1_ref[...], preferred_element_type=jnp.float32)
    # Bias + ReLU epilogue in f32 (VPU-safe on all generations).
    h = jnp.maximum(h + b1_ref[...].astype(jnp.float32), 0.0)

    # Second matmul: cast to the weight dtype only at the MXU boundary and
    # accumulate the partial product over hidden tiles into the f32 scratch.
    acc_ref[...] += jnp.dot(h.astype(w2_ref.dtype), w2_ref[...],
                            preferred_element_type=jnp.float32)

    @pl.when(h_idx == pl.num_programs(1) - 1)
    def _finalize():
        o_ref[...] = acc_ref[...].astype(o_ref.dtype)


# ------------------------------ wrapper ----------------------------------------

def feed_forward(x, w1, b1, w2, b2, *, compute_dtype=jnp.bfloat16):
    """FeedForward forward pass. x: (..., E); returns same shape/dtype as x."""
    orig_shape = x.shape
    E = orig_shape[-1]
    H = w1.shape[1]                       # 4 * E
    x2 = x.reshape(-1, E)
    N = x2.shape[0]

    x_bytes = jnp.dtype(x.dtype).itemsize
    w_bytes = jnp.dtype(compute_dtype).itemsize
    out_bytes = jnp.dtype(x.dtype).itemsize

    ceiling = _vmem_ceiling_bytes()
    tm, th = _choose_tiles(N, E, H, x_bytes, w_bytes, out_bytes, ceiling)

    # Ragged row counts: pad rows up to a tile multiple, slice back afterwards.
    n_pad = _round_up(max(N, tm), tm)
    if n_pad != N:
        x2 = jnp.pad(x2, ((0, n_pad - N), (0, 0)))

    # Weights: only cast if not already stored in the compute dtype (hoist the
    # cast to weight-init time in a real model — see __main__).
    w1c = w1 if w1.dtype == compute_dtype else w1.astype(compute_dtype)
    w2c = w2 if w2.dtype == compute_dtype else w2.astype(compute_dtype)
    b1r = b1.reshape(1, H).astype(jnp.float32)
    b2r = b2.reshape(1, E).astype(jnp.float32)

    grid = (n_pad // tm, H // th)         # rows (parallel), hidden (reduction, last)

    footprint = _tile_vmem_bytes(tm, th, E, x_bytes, w_bytes, out_bytes)
    vmem_limit = int(max(32 * _MiB, min(ceiling, footprint + 16 * _MiB)))

    flops = 4 * n_pad * E * H             # two matmuls
    bytes_accessed = (n_pad * E * (x_bytes + out_bytes)
                      + grid[0] * 2 * E * H * w_bytes    # weights streamed per row tile
                      + (H + E) * 4)

    out = pl.pallas_call(
        ffn_kernel,
        grid_spec=pltpu.PrefetchScalarGridSpec(
            num_scalar_prefetch=0,
            grid=grid,
            in_specs=[
                pl.BlockSpec((tm, E), lambda i, h: (i, 0)),   # x row tile
                pl.BlockSpec((E, th), lambda i, h: (0, h)),   # w1 hidden panel
                pl.BlockSpec((1, th), lambda i, h: (0, h)),   # b1 hidden panel
                pl.BlockSpec((th, E), lambda i, h: (h, 0)),   # w2 hidden panel
                pl.BlockSpec((1, E), lambda i, h: (0, 0)),    # b2 (resident)
            ],
            out_specs=pl.BlockSpec((tm, E), lambda i, h: (i, 0)),
            scratch_shapes=[pltpu.VMEM((tm, E), jnp.float32)],
        ),
        out_shape=jax.ShapeDtypeStruct((n_pad, E), x.dtype),
        compiler_params=pltpu.CompilerParams(
            dimension_semantics=("parallel", "arbitrary"),
            vmem_limit_bytes=vmem_limit),
        cost_estimate=pl.CostEstimate(
            flops=flops, transcendentals=0, bytes_accessed=bytes_accessed),
    )(x2, w1c, b1r, w2c, b2r)

    if n_pad != N:
        out = out[:N]
    return out.reshape(orig_shape)


def _reference(x, w1, b1, w2, b2):
    E = x.shape[-1]
    y = jnp.maximum(x.reshape(-1, E) @ w1 + b1, 0.0) @ w2 + b2
    return y.reshape(x.shape)


# ---------------------------------- main ---------------------------------------

if __name__ == "__main__":
    key = jax.random.PRNGKey(0)
    k1, k2, k3, kx, k4, k5, k6, kx2 = jax.random.split(key, 8)

    # Small config implied by the module: (batch, seq, n_embed) activations.
    n_embed = 32
    batch, seq = 2, 8

    w1 = (0.05 * jax.random.normal(k1, (n_embed, 4 * n_embed))).astype(jnp.float32)
    b1 = jnp.zeros((4 * n_embed,), jnp.float32)
    w2 = (0.05 * jax.random.normal(k2, (4 * n_embed, n_embed))).astype(jnp.float32)
    b2 = (0.01 * jax.random.normal(k3, (n_embed,))).astype(jnp.float32)
    x = jax.random.normal(kx, (batch, seq, n_embed), dtype=jnp.float32)

    # Weight casts hoisted out of the per-call path (stored once as bf16).
    w1_bf, w2_bf = w1.astype(jnp.bfloat16), w2.astype(jnp.bfloat16)

    y = jax.block_until_ready(jax.jit(feed_forward)(x, w1_bf, b1, w2_bf, b2))
    ref = _reference(x, w1, b1, w2, b2)

    assert y.shape == (batch, seq, n_embed)
    assert bool(jnp.all(jnp.isfinite(y)))
    rel = jnp.max(jnp.abs(y - ref)) / (jnp.max(jnp.abs(ref)) + 1e-6)
    assert float(rel) < 5e-2, f"relative error too large: {float(rel)}"

    # Second run at a larger, ragged shape to exercise the multi-tile grid
    # (parallel row tiles x hidden reduction tiles), row padding, and the
    # accumulator path.
    E2, N2 = 256, 1000            # N2 deliberately not a tile multiple
    w1b = (0.05 * jax.random.normal(k4, (E2, 4 * E2))).astype(jnp.float32)
    b1b = (0.01 * jax.random.normal(k5, (4 * E2,))).astype(jnp.float32)
    w2b = (0.05 * jax.random.normal(k6, (4 * E2, E2))).astype(jnp.float32)
    b2b = jnp.zeros((E2,), jnp.float32)
    xb = jax.random.normal(kx2, (N2, E2), dtype=jnp.float32)
    w1b_bf, w2b_bf = w1b.astype(jnp.bfloat16), w2b.astype(jnp.bfloat16)

    yb = jax.block_until_ready(jax.jit(feed_forward)(xb, w1b_bf, b1b, w2b_bf, b2b))
    refb = _reference(xb, w1b, b1b, w2b, b2b)
    assert yb.shape == (N2, E2)
    assert bool(jnp.all(jnp.isfinite(yb)))
    relb = jnp.max(jnp.abs(yb - refb)) / (jnp.max(jnp.abs(refb)) + 1e-6)
    assert float(relb) < 5e-2, f"relative error too large (large shape): {float(relb)}"

    print("KERNEL_OK")
</pallas_src>

<mosaic_0001>
module attributes {stable_mosaic.version = 11 : i64} {
  func.func @ffn_kernel(%arg0: i32, %arg1: i32, %arg2: memref<8x32xf32, #tpu.memory_space<vmem>>, %arg3: memref<32x128xbf16, #tpu.memory_space<vmem>>, %arg4: memref<1x128xf32, #tpu.memory_space<vmem>>, %arg5: memref<128x32xbf16, #tpu.memory_space<vmem>>, %arg6: memref<1x32xf32, #tpu.memory_space<vmem>>, %arg7: memref<8x32xf32, #tpu.memory_space<vmem>>, %arg8: memref<8x32xf32, #tpu.memory_space<vmem>>) attributes {dimension_semantics = [#tpu.dimension_semantics<parallel>, #tpu.dimension_semantics<arbitrary>], iteration_bounds = array<i64: 2, 1>, scalar_prefetch = 0 : i64, scratch_operands = 1 : i64, tpu.core_type = #tpu.core_type<tc>, window_params = [{transform_indices = @transform_0, window_bounds = array<i64: 8, 32>}, {transform_indices = @transform_1, window_bounds = array<i64: 32, 128>}, {transform_indices = @transform_2, window_bounds = array<i64: 1, 128>}, {transform_indices = @transform_3, window_bounds = array<i64: 128, 32>}, {pipeline_mode = #tpu.pipeline_mode<synchronous>, transform_indices = @transform_4, window_bounds = array<i64: 1, 32>}, {transform_indices = @transform_5, window_bounds = array<i64: 8, 32>}]} {
    %c0_i32 = arith.constant 0 : i32
    %0 = arith.cmpi eq, %arg1, %c0_i32 : i32
    %1 = arith.extui %0 : i1 to i32
    %c0_i32_0 = arith.constant 0 : i32
    %2 = arith.cmpi ne, %1, %c0_i32_0 : i32
    scf.if %2 {
      %c0_16 = arith.constant 0 : index
      %c0_17 = arith.constant 0 : index
      %21 = vector.load %arg6[%c0_16, %c0_17] : memref<1x32xf32, #tpu.memory_space<vmem>>, vector<1x32xf32>
      %22 = vector.shape_cast %21 : vector<1x32xf32> to vector<1x32xf32>
      %23 = vector.broadcast %22 : vector<1x32xf32> to vector<8x32xf32>
      %c0_18 = arith.constant 0 : index
      %c0_19 = arith.constant 0 : index
      %24 = vector.load %arg8[%c0_18, %c0_19] : memref<8x32xf32, #tpu.memory_space<vmem>>, vector<8x32xf32>
      tpu.vector_store %arg8[%c0_18, %c0_19], %23 {strides = array<i32>} : memref<8x32xf32, #tpu.memory_space<vmem>>, vector<8x32xf32>,
    } else {
    }
    %c0 = arith.constant 0 : index
    %c0_1 = arith.constant 0 : index
    %3 = vector.load %arg2[%c0, %c0_1] : memref<8x32xf32, #tpu.memory_space<vmem>>, vector<8x32xf32>
    %4 = arith.truncf %3 : vector<8x32xf32> to vector<8x32xbf16>
    %c0_2 = arith.constant 0 : index
    %c0_3 = arith.constant 0 : index
    %5 = vector.load %arg3[%c0_2, %c0_3] : memref<32x128xbf16, #tpu.memory_space<vmem>>, vector<32x128xbf16>
    %cst = arith.constant dense<0.000000e+00> : vector<8x128xf32>
    %6 = tpu.matmul %4, %5, %cst {dimension_numbers = #tpu.dot_dimension_numbers<[1], [0], [0], [1], [0, 0, 1, 1], [], []>} : vector<8x32xbf16>, vector<32x128xbf16>, vector<8x128xf32> -> vector<8x128xf32>
    %c0_4 = arith.constant 0 : index
    %c0_5 = arith.constant 0 : index
    %7 = vector.load %arg4[%c0_4, %c0_5] : memref<1x128xf32, #tpu.memory_space<vmem>>, vector<1x128xf32>
    %8 = vector.broadcast %7 : vector<1x128xf32> to vector<8x128xf32>
    %9 = arith.addf %6, %8 : vector<8x128xf32>
    %cst_6 = arith.constant 0.000000e+00 : f32
    %10 = vector.broadcast %cst_6 : f32 to vector<8x128xf32>
    %11 = arith.maximumf %9, %10 : vector<8x128xf32>
    %c0_7 = arith.constant 0 : index
    %c0_8 = arith.constant 0 : index
    %12 = vector.load %arg8[%c0_7, %c0_8] : memref<8x32xf32, #tpu.memory_space<vmem>>, vector<8x32xf32>
    %13 = arith.truncf %11 : vector<8x128xf32> to vector<8x128xbf16>
    %c0_9 = arith.constant 0 : index
    %c0_10 = arith.constant 0 : index
    %14 = vector.load %arg5[%c0_9, %c0_10] : memref<128x32xbf16, #tpu.memory_space<vmem>>, vector<128x32xbf16>
    %cst_11 = arith.constant dense<0.000000e+00> : vector<8x32xf32>
    %15 = tpu.matmul %13, %14, %cst_11 {dimension_numbers = #tpu.dot_dimension_numbers<[1], [0], [0], [1], [0, 0, 1, 1], [], []>} : vector<8x128xbf16>, vector<128x32xbf16>, vector<8x32xf32> -> vector<8x32xf32>
    %16 = arith.addf %12, %15 : vector<8x32xf32>
    %c0_12 = arith.constant 0 : index
    %c0_13 = arith.constant 0 : index
    %17 = vector.load %arg8[%c0_12, %c0_13] : memref<8x32xf32, #tpu.memory_space<vmem>>, vector<8x32xf32>
    tpu.vector_store %arg8[%c0_12, %c0_13], %16 {strides = array<i32>} : memref<8x32xf32, #tpu.memory_space<vmem>>, vector<8x32xf32>,
    %c0_i32_14 = arith.constant 0 : i32
    %18 = arith.cmpi eq, %arg1, %c0_i32_14 : i32
    %19 = arith.extui %18 : i1 to i32
    %c0_i32_15 = arith.constant 0 : i32
    %20 = arith.cmpi ne, %19, %c0_i32_15 : i32
    scf.if %20 {
      %c0_16 = arith.constant 0 : index
      %c0_17 = arith.constant 0 : index
      %21 = vector.load %arg8[%c0_16, %c0_17] : memref<8x32xf32, #tpu.memory_space<vmem>>, vector<8x32xf32>
      %c0_18 = arith.constant 0 : index
      %c0_19 = arith.constant 0 : index
      %22 = vector.load %arg7[%c0_18, %c0_19] : memref<8x32xf32, #tpu.memory_space<vmem>>, vector<8x32xf32>
      tpu.vector_store %arg7[%c0_18, %c0_19], %21 {strides = array<i32>} : memref<8x32xf32, #tpu.memory_space<vmem>>, vector<8x32xf32>,
    } else {
    }
    return
  }
  func.func @transform_0(%arg0: i32, %arg1: i32) -> (i32, i32) {
    %c0_i32 = arith.constant 0 : i32
    %c0_i32_0 = arith.constant 0 : i32
    return %arg0, %c0_i32 : i32, i32
  }
  func.func @transform_1(%arg0: i32, %arg1: i32) -> (i32, i32) {
    %c0_i32 = arith.constant 0 : i32
    %c0_i32_0 = arith.constant 0 : i32
    return %c0_i32, %arg1 : i32, i32
  }
  func.func @transform_2(%arg0: i32, %arg1: i32) -> (i32, i32) {
    %c0_i32 = arith.constant 0 : i32
    %c0_i32_0 = arith.constant 0 : i32
    return %c0_i32, %arg1 : i32, i32
  }
  func.func @transform_3(%arg0: i32, %arg1: i32) -> (i32, i32) {
    %c0_i32 = arith.constant 0 : i32
    %c0_i32_0 = arith.constant 0 : i32
    return %arg1, %c0_i32 : i32, i32
  }
  func.func @transform_4(%arg0: i32, %arg1: i32) -> (i32, i32) {
    %c0_i32 = arith.constant 0 : i32
    %c0_i32_0 = arith.constant 0 : i32
    %c0_i32_1 = arith.constant 0 : i32
    return %c0_i32, %c0_i32_0 : i32, i32
  }
  func.func @transform_5(%arg0: i32, %arg1: i32) -> (i32, i32) {
    %c0_i32 = arith.constant 0 : i32
    %c0_i32_0 = arith.constant 0 : i32
    return %arg0, %c0_i32 : i32, i32
  }
}

</mosaic_0001>

<bundles_post_ra>
// kernel: feed_forward.1
= control target key start
LH: loop header
LB: loop body
LE: loop exit
PB: predicated region body
PF: predicated region fallthrough
CT: control target
= control target key end

     0   :  { %10 = vsyncpa [#allocation4], 0  ;;  %s916_s0 = inlined_call_operand.vmem [shape: f32[16,32], index: 0, kind: input, shape index: {}]   ;;  %s917_s1 = inlined_call_operand.vmem [shape: bf16[32,128], index: 1, kind: input, shape index: {}]   ;;  %s918_s2 = inlined_call_operand.vmem [shape: f32[1,128], index: 2, kind: input, shape index: {}]   ;;  %s919_s3 = inlined_call_operand.vmem [shape: bf16[128,32], index: 3, kind: input, shape index: {}]   ;;  %s920_s4 = inlined_call_operand.vmem [shape: f32[1,32], index: 4, kind: input, shape index: {}]   ;;  %s921_s5 = inlined_call_operand.hbm [shape: f32[16,32], index: 5, kind: output, shape index: {}]  }
   0x1   :  { %12 = vsyncpa [#allocation4 + $0x1], 0  ;;  %s779_s18 = smov 0   ;;  %s781_s19 = smov 0  }
   0x2   :  { %s783_s20 = smov 0   ;;  %s785_s21 = smov 0  }
   0x3   :  { %s787_s22 = smov 0   ;;  %s789_s23 = smov 0  }
   0x4 LB: > { %s547_s24 = sadd.s32 4294967295, %s747_s23   ;;  %s548_s25 = sadd.s32 4294967294, %s747_s23   ;;  %s747_s23 = sphi %s789_s23, %s18_s23   ;;  %s743_s22 = sphi %s787_s22, %s928_s22   ;;  %s739_s21 = sphi %s785_s21, %s927_s21   ;;  %s735_s20 = sphi %s783_s20, %s926_s20   ;;  %s731_s19 = sphi %s781_s19, %s925_s19   ;;  %s727_s18 = sphi %s779_s18, %s924_s18  }
   0x5   : > { %s30_s26 = sadd.s32 1, %s743_s22  ;;  %s162_s27 = sadd.s32 1, %s735_s20 }
   0x6   : > { %p32_p0 = scmp.ge.s32.totalorder %s30_s26, 2  ;;  %p172_p1 = scmp.ne.s32.totalorder %s735_s20, %s731_s19 }
   0x7   : > { %p173_p2 = scmp.eq.s32.totalorder %s547_s24, 1  ;;  %p178_p3 = scmp.ne.s32.totalorder %s731_s19, %s727_s18 }
   0x8   : > { %s930_s26 = smov (%p32_p0, %s30_s26), 0  ;;  %p179_p5 = scmp.eq.s32.totalorder %s548_s25, 1 }
   0x9   : > { %p819_p4 = por %p173_p2, %p172_p1  ;;  %s159_s29 = ssub.s32 %s743_s22, %s930_s26 }
   0xa   : > { %p554_p6 = scmp.ge.s32.totalorder %s747_s23, 1  ;;  %p160_p7 = scmp.eq.s32.totalorder %s159_s29, 0 }
   0xb   : > { %p826_p8 = por %p179_p5, %p178_p3  ;;  %p229_p9 = scmp.lt.s32.totalorder %s747_s23, 3 }
   0xc   : > { %s832_s6 = scalar_select %p160_p7, %s735_s20, %s162_s27  }
   0xd   : > { %p230_p10 = pnand %p554_p6, %p229_p9 }
   0xe   : > { %p268_p11 = scmp.lt.s32.totalorder (!%p230_p10), %s739_s21, 1  ;;  %s599_s8 = sshll.u32 (!%p230_p10), %s739_s21, 3 }
   0xf   : > { %233 = sbr.rel (%p230_p10) target bundleno = 299 (0x12b), region = 40  ;;  %s433_s11 = scalar_lea.hbm (!%p230_p10), %s921_s5, %s599_s8 }
  0x10   : > { %s437_s14 = sshll.u32 (!%p230_p10), %s433_s11, 4  ;;  %s689_s25 = scalar_lea.hbm (!%p230_p10), %s921_s5, 16  ;;  %s438_s14 = int_to_ptr.hbm [resolvable:$true] %s437_s14 }
  0x11   : > { %s683_s16 = sshra.s32 (!%p230_p10), %s438_s14, 4  ;;  %s684_s16 = int_to_ptr.hbm [resolvable:$true] %s683_s16 }
  0x12   : > { %p690_p1 = scmp.lt.s32.totalorder (!%p230_p10), %s684_s16, %s921_s5 }
  0x14   : > { %v603_v0 = vld [vmem:[%s917_s1 + $0x8] sm:$0xff]  ;;  %v667_v1 = vld [vmem:[%s920_s4] ss:$0 sm:$0xff]  ;;  %v611_v2 = vld [vmem:[%s919_s3 + $0x38] sm:$0xff]  ;;  %s269_s15 = scalar_select %p268_p11, %s739_s21, 1  ;;  %vm294_vm0 = vcmask 261120  }
  0x15   : > { %328 = vmatpush.bf16.msra.mxu0 %v603_v0  ;;  %v602_v3 = vld [vmem:[%s917_s1] sm:$0xff]  ;;  %295 = vst.msk [vmem:[#allocation2] sm:$0xff] %vm294_vm0, %v667_v1  ;;  %402 = vmatpush.bf16.msra.mxu1 %v611_v2  ;;  %v610_v4 = vld [vmem:[%s919_s3 + $0x30] sm:$0xff]  ;;  %v609_v7 = vld [vmem:[%s919_s3 + $0x28] sm:$0xff]  ;;  %s685_s21 = scalar_lea.hbm %s684_s16, 8 }
  0x16   : > { %s556_s24 = sshll.u32 %s269_s15, 3  ;;  %v608_v8 = vld [vmem:[%s919_s3 + $0x20] sm:$0xff]  ;;  %v607_v9 = vld [vmem:[%s919_s3 + $0x18] sm:$0xff]  ;;  %v606_v10 = vld [vmem:[%s919_s3 + $0x10] sm:$0xff]  ;;  %p686_p12 = scmp.ne.s32.totalorder %s684_s16, %s685_s21 }
  0x17   : > { %s271_s29 = scalar_lea.vmem %s916_s0, %s556_s24  ;;  %v605_v11 = vld [vmem:[%s919_s3 + $0x8] sm:$0xff]  ;;  %v604_v12 = vld [vmem:[%s919_s3] sm:$0xff]  ;;  %p691_p2 = scmp.lt.s32.totalorder %s689_s25, %s685_s21 }
  0x18   : > { %v296_v5 = vld [vmem:[%s271_s29] sm:$0xff]  ;;  %s265_s29 = sand.u32 1, %s731_s19   ;;  %p687_p13 = pnand %p686_p12, %p819_p4 }
  0x19   : > { %329 = vmatpush.bf16.msra.mxu0 %v602_v3  ;;  %v297_v6 = vpack.c.bf16 %v296_v5, %v296_v5  ;;  %403 = vmatpush.bf16.msra.mxu1 %v610_v4  ;;  %v668_v13 = vld [vmem:[%s918_s2] ss:$0 sm:$0xff]  ;;  %s555_s7 = sshll.u32 %s265_s29, 3  ;;  %s423_s15 = scalar_lea.sflag [#allocation4], %s265_s29 }
  0x1a   : > { %s267_s12 = scalar_lea.vmem [#allocation3], %s555_s7  ;;  %p688_p0 = pneg %p687_p13 }
  0x1b   : > { %s435_s13 = sshll.u32 %s267_s12, 4  ;;  %p692_p3 = por %p691_p2, %p690_p1  ;;  %s436_s13 = int_to_ptr.vmem [resolvable:$true] %s435_s13 }
  0x1c   : > { %565 = vmatmul.msk.bf16.vlgmr.msra.gmra.mxu0 %vm294_vm0, %v297_v6  ;;  %v336_v19 = vld [vmem:[#allocation2] sm:$0xff] }
  0x1d   : > { %404 = vmatpush.bf16.msra.mxu1 %v609_v7  ;;  %p693_p5 = pnand %p692_p3, %p688_p0 }
  0x21   : > { %405 = vmatpush.bf16.msra.mxu1 %v608_v8 }
  0x25   : > { %406 = vmatpush.bf16.msra.mxu1 %v607_v9 }
  0x29   : > { %407 = vmatpush.bf16.msra.mxu1 %v606_v10 }
  0x2d   : > { %408 = vmatpush.bf16.msra.mxu1 %v605_v11 }
  0x31   : > { %409 = vmatpush.bf16.msra.mxu1 %v604_v12 }
  0x99   : > { %v331_v14 = vpop.f32.mrf.mxu0 }
  0x9a   : > { %v332_v15 = vadd.f32 %v668_v13, %v331_v14 }
  0x9c   : > { %v335_v16 = vmax.f32 %v332_v15, 0.0 }
  0x9e   : > { %v337_v17 = vpack.c.bf16 %v335_v16, %v335_v16 }
  0xa0   : > { %410 = vmatmul.bf16.vlgmr.msra.gmra.mxu1 %v337_v17 }
  0xa1   : > { %v333_v18 = vpop.f32.mrf.mxu0 }
 0x11d   : > { %v411_v20 = vpop.f32.mrf.mxu1 }
 0x11e   : > { %v415_v21 = vadd.f32 %v411_v20, %v336_v19 }
 0x120   : > { %416 = vst.msk [vmem:[#allocation2] sm:$0xff] %vm294_vm0, %v415_v21 }
 0x125   : > { %v413_v22 = vpop.f32.mrf.mxu1 }
 0x127   : > { %v420_v23 = vld [vmem:[#allocation2] sm:$0xff] }
 0x128   : > { %421 = vst.msk [vmem:[%s267_s12] sm:$0xff] %vm294_vm0, %v420_v23 }
 0x129   : > { %696 = shalt.err (!%p693_p5)
}
 0x12a   : > { %612 = dma.vmem_to_hbm [thread:$0]  (%p819_p4), %s436_s13, 128, %s438_s14, %s423_s15  }
 0x12b PF: > { %p618_p6 = scmp.ge.s32.totalorder %s747_s23, 2  ;;  %s449_s29 = sand.u32 1, %s727_s18  }
 0x12c   : > { %s450_s8 = scalar_lea.sflag [#allocation4], %s449_s29 }
 0x12d   : > { %p615_p7 = pnand %p618_p6, %p826_p8 }
 0x12f   : > { %p616_p9 = pneg %p615_p7 }
 0x131   : > { %722 = dma.done.wait (%p616_p9), %s450_s8, 128  }
 0x132   : > { %724 = vsyncadd (%p616_p9), %s450_s8, 4294967168  ;;  %s18_s23 = sadd.s32 1, %s747_s23   ;;  %s924_s18 = smov %s731_s19 }
 0x133   : > { %p15_p10 = scmp.ge.s32.totalorder %s18_s23, 4   ;;  %s925_s19 = smov %s735_s20 }
 0x134   : > { %s926_s20 = smov %s832_s6  ;;  %s927_s21 = smov %s743_s22 }
 0x135   : > { %s928_s22 = smov %s930_s26  ;;  %17 = sbr.rel (!%p15_p10) target bundleno = 4 (0x4), region = 92 }
 0x13a   :  { %456 = vsyncpa [#allocation4], 1 }
 0x13b   :  { %458 = vsyncpa [#allocation4 + $0x1], 1 }

</bundles_post_ra>
